<compile_context>
chip_gen: v7x
topology: tpu7x:2x2x1
jax: 0.10.0
libtpu: 0.0.40
codegen_flags: <defaults>
</compile_context>

<pallas_src>
import functools

import jax
import jax.numpy as jnp
from jax.experimental import pallas as pl
from jax.experimental.pallas import tpu as pltpu


def _build_conv_matrix(w_spatial, H, W):
    """Dense im2col matrix for the KxK SAME cross-correlation over the stacked
    (max, avg) planes: conv_flat(HW) = planes_flat(2*HW) @ mat(2*HW, HW)."""
    K = int(w_spatial.shape[-1])
    P = K // 2
    HW = H * W
    oh = jnp.arange(H).reshape(H, 1, 1, 1)
    ow = jnp.arange(W).reshape(1, W, 1, 1)
    kh = jnp.arange(K).reshape(1, 1, K, 1)
    kw = jnp.arange(K).reshape(1, 1, 1, K)
    ih = oh + kh - P                                       # (H,1,K,1)
    iw = ow + kw - P                                       # (1,W,1,K)
    valid = (ih >= 0) & (ih < H) & (iw >= 0) & (iw < W)    # (H,W,K,K)
    in_idx = jnp.clip(ih, 0, H - 1) * W + jnp.clip(iw, 0, W - 1)   # (H,W,K,K)
    out_idx = oh * W + ow                                           # (H,W,1,1)
    in_flat = jnp.broadcast_to(in_idx, (H, W, K, K)).reshape(-1)
    out_flat = jnp.broadcast_to(out_idx, (H, W, K, K)).reshape(-1)

    def plane(wp):  # wp: (K, K)
        vals = jnp.where(valid, wp.astype(jnp.float32)[None, None, :, :], 0.0)
        return jnp.zeros((HW, HW), jnp.float32).at[in_flat, out_flat].add(
            vals.reshape(-1))

    return jnp.concatenate([plane(w_spatial[0]), plane(w_spatial[1])], axis=0)


def _cbam_kernel(x_ref, w1t_ref, w2t_ref, cm_ref, o_ref, *, block_n):
    x = x_ref[...].astype(jnp.float32)                  # (Bt, C, HW) lane-dense

    # ---------------- channel attention (batched shared MLP) ----------------
    mx = jnp.max(x, axis=-1)                            # (Bt, C)  AdaptiveMaxPool2d(1)
    av = jnp.mean(x, axis=-1)                           # (Bt, C)  AdaptiveAvgPool2d(1)
    pools = jnp.concatenate([mx, av], axis=0)           # (2*Bt, C)
    h = jnp.maximum(
        jnp.dot(pools, w1t_ref[...], preferred_element_type=jnp.float32),
        0.0)                                            # (2*Bt, Cr)  ReLU
    mlp = jnp.dot(h, w2t_ref[...],
                  preferred_element_type=jnp.float32)   # (2*Bt, C)
    ca = jax.nn.sigmoid(mlp[:block_n] + mlp[block_n:])  # (Bt, C)
    xs = x * ca[:, :, None]                             # broadcast over lanes

    # ------------- spatial attention (7x7 conv as one MXU matmul) -----------
    cmax = jnp.max(xs, axis=1)                          # (Bt, HW) max over C
    cavg = jnp.mean(xs, axis=1)                         # (Bt, HW) mean over C
    planes = jnp.concatenate([cmax, cavg], axis=-1)     # (Bt, 2*HW)
    conv = jnp.dot(planes, cm_ref[...],
                   preferred_element_type=jnp.float32)  # (Bt, HW)
    sa = jax.nn.sigmoid(conv)                           # (Bt, HW)

    o_ref[...] = (xs * sa[:, None, :]).astype(o_ref.dtype)   # lane-dense store


def _hw_config():
    """(two_cores, vmem_limit_bytes) — generation-aware defaults."""
    kind = ""
    try:
        kind = jax.devices()[0].device_kind.lower()
    except Exception:
        pass
    two_cores = "v7" in kind                 # v7x: 2 TensorCores / chip
    vmem_phys = (64 if two_cores else 128) * 1024 * 1024
    try:
        info = pltpu.get_tpu_info()
        vmem_phys = int(getattr(info, "vmem_capacity_bytes", vmem_phys))
    except Exception:
        pass
    # ~half of physical: 64 MiB on 1-TC v5e/v6e, ~32 MiB/core on v7x.
    vmem_limit = max(16 * 1024 * 1024, min(vmem_phys // 2, 64 * 1024 * 1024))
    return two_cores, vmem_limit


def _pick_block_n(n, c, hw, itemsize, budget_bytes, two_cores):
    """Largest divisor of n whose double-buffered in+out blocks (plus ~4 f32
    working copies) fit the budget; reserve >=2 grid steps only on 2-TC chips."""
    per_elem = c * hw * (4 * itemsize + 4 * 4)
    cap = max(1, budget_bytes // max(1, per_elem))
    cap = min(cap, n)
    if two_cores and n >= 2:
        cap = min(cap, max(1, n // 2))
    for bt in range(cap, 0, -1):
        if n % bt == 0:
            return bt
    return 1


def cbam_forward(x, w1, w2, w_spatial, *, block_n=None, vmem_limit_bytes=None):
    """x: (N, C, H, W); w1: (Cr, C); w2: (C, Cr); w_spatial: (2, k, k).

    x may be f32 or bf16; all in-kernel accumulation is f32 and the output
    dtype follows x.dtype.
    """
    N, C, H, W = x.shape
    Cr = w1.shape[0]
    HW = H * W

    two_cores, auto_vmem = _hw_config()
    if vmem_limit_bytes is None:
        vmem_limit_bytes = auto_vmem

    conv_mat = _build_conv_matrix(w_spatial, H, W)      # (2*HW, HW) f32
    conv_bytes = 2 * HW * HW * 4
    weight_bytes = 2 * 2 * C * Cr * 4                   # w1t + w2t, double-buffered

    if block_n is None:
        budget = vmem_limit_bytes - 2 * conv_bytes - weight_bytes
        block_n = _pick_block_n(N, C, HW, x.dtype.itemsize, budget, two_cores)
    assert N % block_n == 0
    grid = (N // block_n,)

    # TODO(synk): for very large feature maps (H*W >~ 1600 on v7x) the dense
    # (2*HW, HW) conv matrix no longer fits VMEM; a roll/tap fallback or a
    # C-tiled two-pass variant would be needed there.

    x_flat = x.reshape(N, C, HW)                        # lane-dense (free in XLA)
    w1t = w1.astype(jnp.float32).T                      # (C, Cr)
    w2t = w2.astype(jnp.float32).T                      # (Cr, C)

    kernel = functools.partial(_cbam_kernel, block_n=block_n)
    out = pl.pallas_call(
        kernel,
        out_shape=jax.ShapeDtypeStruct((N, C, HW), x.dtype),
        grid_spec=pltpu.PrefetchScalarGridSpec(
            num_scalar_prefetch=0,
            grid=grid,
            in_specs=[
                pl.BlockSpec((block_n, C, HW), lambda n: (n, 0, 0)),
                pl.BlockSpec((C, Cr), lambda n: (0, 0)),
                pl.BlockSpec((Cr, C), lambda n: (0, 0)),
                pl.BlockSpec((2 * HW, HW), lambda n: (0, 0)),
            ],
            out_specs=pl.BlockSpec((block_n, C, HW), lambda n: (n, 0, 0)),
        ),
        compiler_params=pltpu.CompilerParams(
            dimension_semantics=("parallel",),
            vmem_limit_bytes=vmem_limit_bytes),
    )(x_flat, w1t, w2t, conv_mat)
    return out.reshape(N, C, H, W)


def cbam_reference(x, w1, w2, w_spatial):
    """Pure-JAX reference matching the PyTorch forward."""
    mx = jnp.max(x, axis=(2, 3), keepdims=True)
    av = jnp.mean(x, axis=(2, 3), keepdims=True)

    def mlp(v):
        h = jax.nn.relu(jnp.einsum('rc,nchw->nrhw', w1, v))
        return jnp.einsum('cr,nrhw->nchw', w2, h)

    ca = jax.nn.sigmoid(mlp(mx) + mlp(av))
    x = x * ca
    cmax = jnp.max(x, axis=1, keepdims=True)
    cavg = jnp.mean(x, axis=1, keepdims=True)
    sp = jnp.concatenate([cmax, cavg], axis=1)            # (N, 2, H, W)
    conv = jax.lax.conv_general_dilated(
        sp, w_spatial[None], (1, 1), 'SAME',
        dimension_numbers=('NCHW', 'OIHW', 'NCHW'))       # (N, 1, H, W)
    return x * jax.nn.sigmoid(conv)


if __name__ == "__main__":
    N, C, H, W = 2, 32, 16, 16
    reduction, spatial_kernel = 16, 7
    Cr = C // reduction

    key = jax.random.PRNGKey(0)
    kx, k1, k2, k3 = jax.random.split(key, 4)
    x = jax.random.normal(kx, (N, C, H, W), dtype=jnp.float32)
    # Synthetic parameters (Conv2d weights, bias=False):
    #   mlp[0]: (C//r, C, 1, 1) -> (Cr, C);  mlp[2]: (C, C//r, 1, 1) -> (C, Cr)
    #   spatial conv: (1, 2, 7, 7) -> (2, 7, 7)
    w1 = 0.1 * jax.random.normal(k1, (Cr, C), dtype=jnp.float32)
    w2 = 0.1 * jax.random.normal(k2, (C, Cr), dtype=jnp.float32)
    w_spatial = 0.05 * jax.random.normal(
        k3, (2, spatial_kernel, spatial_kernel), dtype=jnp.float32)

    out = jax.block_until_ready(cbam_forward(x, w1, w2, w_spatial))
    ref = jax.block_until_ready(cbam_reference(x, w1, w2, w_spatial))

    assert out.shape == (N, C, H, W)
    assert jnp.allclose(out, ref, rtol=1e-5, atol=1e-5), (
        float(jnp.max(jnp.abs(out - ref))))
    print("KERNEL_OK")
</pallas_src>

<mosaic_0001>
module attributes {stable_mosaic.version = 11 : i64} {
  func.func @_cbam_kernel(%arg0: i32, %arg1: memref<2x32x256xf32, #tpu.memory_space<vmem>>, %arg2: memref<32x2xf32, #tpu.memory_space<vmem>>, %arg3: memref<2x32xf32, #tpu.memory_space<vmem>>, %arg4: memref<512x256xf32, #tpu.memory_space<vmem>>, %arg5: memref<2x32x256xf32, #tpu.memory_space<vmem>>) attributes {dimension_semantics = [#tpu.dimension_semantics<parallel>], iteration_bounds = array<i64: 1>, scalar_prefetch = 0 : i64, scratch_operands = 0 : i64, tpu.core_type = #tpu.core_type<tc>, window_params = [{transform_indices = @transform_0, window_bounds = array<i64: 2, 32, 256>}, {pipeline_mode = #tpu.pipeline_mode<synchronous>, transform_indices = @transform_1, window_bounds = array<i64: 32, 2>}, {pipeline_mode = #tpu.pipeline_mode<synchronous>, transform_indices = @transform_2, window_bounds = array<i64: 2, 32>}, {pipeline_mode = #tpu.pipeline_mode<synchronous>, transform_indices = @transform_3, window_bounds = array<i64: 512, 256>}, {transform_indices = @transform_4, window_bounds = array<i64: 2, 32, 256>}]} {
    %c0 = arith.constant 0 : index
    %c0_0 = arith.constant 0 : index
    %c0_1 = arith.constant 0 : index
    %0 = vector.load %arg1[%c0, %c0_0, %c0_1] : memref<2x32x256xf32, #tpu.memory_space<vmem>>, vector<2x32x256xf32>
    %cst = arith.constant dense<0xFF800000> : vector<2x32xf32>
    %1 = vector.multi_reduction <maximumf>, %0, %cst [2] : vector<2x32x256xf32> to vector<2x32xf32>
    %cst_2 = arith.constant dense<0.000000e+00> : vector<2x32xf32>
    %2 = vector.multi_reduction <add>, %0, %cst_2 [2] : vector<2x32x256xf32> to vector<2x32xf32>
    %cst_3 = arith.constant 2.560000e+02 : f32
    %3 = vector.broadcast %cst_3 : f32 to vector<2x32xf32>
    %4 = arith.divf %2, %3 : vector<2x32xf32>
    %5 = tpu.concatenate %1, %4 in 0 : vector<2x32xf32>, vector<2x32xf32> -> vector<4x32xf32>
    %c0_4 = arith.constant 0 : index
    %c0_5 = arith.constant 0 : index
    %6 = vector.load %arg2[%c0_4, %c0_5] : memref<32x2xf32, #tpu.memory_space<vmem>>, vector<32x2xf32>
    %cst_6 = arith.constant dense<0.000000e+00> : vector<4x2xf32>
    %7 = tpu.matmul %5, %6, %cst_6 {dimension_numbers = #tpu.dot_dimension_numbers<[1], [0], [0], [1], [0, 0, 1, 1], [], []>} : vector<4x32xf32>, vector<32x2xf32>, vector<4x2xf32> -> vector<4x2xf32>
    %cst_7 = arith.constant 0.000000e+00 : f32
    %8 = vector.broadcast %cst_7 : f32 to vector<4x2xf32>
    %9 = arith.maximumf %7, %8 : vector<4x2xf32>
    %c0_8 = arith.constant 0 : index
    %c0_9 = arith.constant 0 : index
    %10 = vector.load %arg3[%c0_8, %c0_9] : memref<2x32xf32, #tpu.memory_space<vmem>>, vector<2x32xf32>
    %cst_10 = arith.constant dense<0.000000e+00> : vector<4x32xf32>
    %11 = tpu.matmul %9, %10, %cst_10 {dimension_numbers = #tpu.dot_dimension_numbers<[1], [0], [0], [1], [0, 0, 1, 1], [], []>} : vector<4x2xf32>, vector<2x32xf32>, vector<4x32xf32> -> vector<4x32xf32>
    %12 = vector.extract_strided_slice %11 {offsets = [0, 0], sizes = [2, 32], strides = [1, 1]} : vector<4x32xf32> to vector<2x32xf32>
    %13 = vector.extract_strided_slice %11 {offsets = [2, 0], sizes = [2, 32], strides = [1, 1]} : vector<4x32xf32> to vector<2x32xf32>
    %14 = arith.addf %12, %13 : vector<2x32xf32>
    %15 = arith.negf %14 : vector<2x32xf32>
    %16 = math.exp %15 : vector<2x32xf32>
    %cst_11 = arith.constant 1.000000e+00 : f32
    %17 = vector.broadcast %cst_11 : f32 to vector<2x32xf32>
    %18 = arith.addf %17, %16 : vector<2x32xf32>
    %19 = arith.divf %17, %18 : vector<2x32xf32>
    %20 = vector.shape_cast %19 : vector<2x32xf32> to vector<2x32x1xf32>
    %21 = vector.broadcast %20 : vector<2x32x1xf32> to vector<2x32x256xf32>
    %22 = arith.mulf %0, %21 : vector<2x32x256xf32>
    %cst_12 = arith.constant dense<0xFF800000> : vector<2x256xf32>
    %23 = vector.multi_reduction <maximumf>, %22, %cst_12 [1] : vector<2x32x256xf32> to vector<2x256xf32>
    %cst_13 = arith.constant dense<0.000000e+00> : vector<2x256xf32>
    %24 = vector.multi_reduction <add>, %22, %cst_13 [1] : vector<2x32x256xf32> to vector<2x256xf32>
    %cst_14 = arith.constant 3.200000e+01 : f32
    %25 = vector.broadcast %cst_14 : f32 to vector<2x256xf32>
    %26 = arith.divf %24, %25 : vector<2x256xf32>
    %27 = tpu.concatenate %23, %26 in 1 : vector<2x256xf32>, vector<2x256xf32> -> vector<2x512xf32>
    %c0_15 = arith.constant 0 : index
    %c0_16 = arith.constant 0 : index
    %28 = vector.load %arg4[%c0_15, %c0_16] : memref<512x256xf32, #tpu.memory_space<vmem>>, vector<512x256xf32>
    %cst_17 = arith.constant dense<0.000000e+00> : vector<2x256xf32>
    %29 = tpu.matmul %27, %28, %cst_17 {dimension_numbers = #tpu.dot_dimension_numbers<[1], [0], [0], [1], [0, 0, 1, 1], [], []>} : vector<2x512xf32>, vector<512x256xf32>, vector<2x256xf32> -> vector<2x256xf32>
    %30 = arith.negf %29 : vector<2x256xf32>
    %31 = math.exp %30 : vector<2x256xf32>
    %cst_18 = arith.constant 1.000000e+00 : f32
    %32 = vector.broadcast %cst_18 : f32 to vector<2x256xf32>
    %33 = arith.addf %32, %31 : vector<2x256xf32>
    %34 = arith.divf %32, %33 : vector<2x256xf32>
    %35 = vector.shape_cast %34 : vector<2x256xf32> to vector<2x1x256xf32>
    %36 = vector.broadcast %35 : vector<2x1x256xf32> to vector<2x32x256xf32>
    %37 = arith.mulf %22, %36 : vector<2x32x256xf32>
    %c0_19 = arith.constant 0 : index
    %c0_20 = arith.constant 0 : index
    %c0_21 = arith.constant 0 : index
    %38 = vector.load %arg5[%c0_19, %c0_20, %c0_21] : memref<2x32x256xf32, #tpu.memory_space<vmem>>, vector<2x32x256xf32>
    tpu.vector_store %arg5[%c0_19, %c0_20, %c0_21], %37 {strides = array<i32>} : memref<2x32x256xf32, #tpu.memory_space<vmem>>, vector<2x32x256xf32>,
    return
  }
  func.func @transform_0(%arg0: i32) -> (i32, i32, i32) {
    %c0_i32 = arith.constant 0 : i32
    %c0_i32_0 = arith.constant 0 : i32
    %c0_i32_1 = arith.constant 0 : i32
    return %arg0, %c0_i32, %c0_i32_0 : i32, i32, i32
  }
  func.func @transform_1(%arg0: i32) -> (i32, i32) {
    %c0_i32 = arith.constant 0 : i32
    %c0_i32_0 = arith.constant 0 : i32
    %c0_i32_1 = arith.constant 0 : i32
    return %c0_i32, %c0_i32_0 : i32, i32
  }
  func.func @transform_2(%arg0: i32) -> (i32, i32) {
    %c0_i32 = arith.constant 0 : i32
    %c0_i32_0 = arith.constant 0 : i32
    %c0_i32_1 = arith.constant 0 : i32
    return %c0_i32, %c0_i32_0 : i32, i32
  }
  func.func @transform_3(%arg0: i32) -> (i32, i32) {
    %c0_i32 = arith.constant 0 : i32
    %c0_i32_0 = arith.constant 0 : i32
    %c0_i32_1 = arith.constant 0 : i32
    return %c0_i32, %c0_i32_0 : i32, i32
  }
  func.func @transform_4(%arg0: i32) -> (i32, i32, i32) {
    %c0_i32 = arith.constant 0 : i32
    %c0_i32_0 = arith.constant 0 : i32
    %c0_i32_1 = arith.constant 0 : i32
    return %arg0, %c0_i32, %c0_i32_0 : i32, i32, i32
  }
}

</mosaic_0001>

<bundles_post_ra>
// kernel: tpu_custom_call.1
= control target key start
LH: loop header
LB: loop body
LE: loop exit
PB: predicated region body
PF: predicated region fallthrough
CT: control target
= control target key end

     0   :  { %9 = vsyncpa [#allocation3], 0  ;;  %s1569_s0 = inlined_call_operand.hbm [shape: f32[2,32,256], index: 0, kind: input, shape index: {}]   ;;  %s1570_s1 = inlined_call_operand.hbm [shape: f32[32,2], index: 1, kind: input, shape index: {}]   ;;  %s1571_s2 = inlined_call_operand.hbm [shape: f32[2,32], index: 2, kind: input, shape index: {}]   ;;  %s1572_s3 = inlined_call_operand.hbm [shape: f32[512,256], index: 3, kind: input, shape index: {}]   ;;  %s1573_s4 = inlined_call_operand.hbm [shape: f32[2,32,256], index: 4, kind: output, shape index: {}]  }
   0x1   :  { %10 = vsyncpa [#allocation6], 0 }
   0x2   :  { %11 = vsyncpa [#allocation9], 0 }
   0x3   :  { %12 = vsyncpa [#allocation4], 0  ;;  %s1252_s15 = smov [#allocation5]   ;;  %s1134_s19 = scalar_lea.hbm %s1570_s1, 512 }
   0x4   :  { %s30_s16 = sshll.u32 %s1252_s15, 4  ;;  %p1135_p0 = scmp.ne.s32.totalorder %s1570_s1, %s1134_s19  ;;  %s31_s16 = int_to_ptr.vmem [resolvable:$true] %s30_s16 }
   0x5   :  { %p1138_p1 = scmp.lt.u32.totalorder %s1134_s19, %s1570_s1 }
   0x7   :  { %p1140_p2 = pnand %p1138_p1, %p1135_p0 }
   0x9   :  { %1143 = shalt.err (!%p1140_p2)
}
   0xa   :  { %s1144_s24 = scalar_lea.vmem %s31_s16, 512  ;;  %p1149_p4 = scmp.lt.s32.totalorder %s31_s16, %s31_s16 }
   0xb   :  { %p1145_p3 = scmp.ne.s32.totalorder %s31_s16, %s1144_s24  ;;  %p1150_p5 = scmp.lt.s32.totalorder %s1144_s24, %s1144_s24 }
   0xd   :  { %p1151_p6 = por %p1150_p5, %p1149_p4 }
   0xf   :  { %p1152_p7 = pnand %p1151_p6, %p1145_p3 }
  0x11   :  { %1155 = shalt.err (!%p1152_p7)
}
  0x12   :  { %s1253_s25 = smov 128   ;;  %s1254_s26 = smov 8  }
  0x13   :  { %36 = dma.hbm_to_vmem [thread:$0]  %s1570_s1, 512, %s31_s16, [#allocation6], %s1253_s25, %s1253_s25, %s1254_s26  }
  0x14   :  { %s1255_s29 = smov [#allocation2]   ;;  %s1156_s7 = scalar_lea.hbm %s1569_s0, 2048 }
  0x15   :  { %s18_s30 = sshll.u32 %s1255_s29, 4  ;;  %p1157_p8 = scmp.ne.s32.totalorder %s1569_s0, %s1156_s7  ;;  %s19_s30 = int_to_ptr.vmem [resolvable:$true] %s18_s30 }
  0x16   :  { %p1160_p9 = scmp.lt.u32.totalorder %s1156_s7, %s1569_s0 }
  0x18   :  { %p1162_p10 = pnand %p1160_p9, %p1157_p8 }
  0x1a   :  { %1165 = shalt.err (!%p1162_p10)
}
  0x1b   :  { %s1166_s12 = scalar_lea.vmem %s19_s30, 2048  ;;  %p1171_p12 = scmp.lt.s32.totalorder %s19_s30, %s19_s30 }
  0x1c   :  { %p1167_p11 = scmp.ne.s32.totalorder %s19_s30, %s1166_s12  ;;  %p1172_p13 = scmp.lt.s32.totalorder %s1166_s12, %s1166_s12 }
  0x1e   :  { %p1173_p0 = por %p1172_p13, %p1171_p12 }
  0x20   :  { %p1174_p1 = pnand %p1173_p0, %p1167_p11 }
  0x22   :  { %1177 = shalt.err (!%p1174_p1)
}
  0x23   :  { %s1256_s1 = smov 256   ;;  %s1257_s13 = smov 16  }
  0x24   :  { %24 = dma.hbm_to_vmem [thread:$0]  %s1569_s0, 2048, %s19_s30, [#allocation3], %s1256_s1, %s1256_s1, %s1257_s13  }
  0x25   :  { %s1258_s16 = smov [#allocation7]   ;;  %s1259_s18 = smov [#allocation8]  }
  0x26   :  { %s43_s17 = sshll.u32 %s1258_s16, 4  ;;  %s52_s19 = sshll.u32 %s1259_s18, 4  ;;  %s44_s17 = int_to_ptr.vmem [resolvable:$true] %s43_s17  ;;  %s1317_s19 = int_to_ptr.vmem [resolvable:$true] %s52_s19 }
  0x27   :  { %s1178_s22 = scalar_lea.hbm %s1571_s2, 32 }
  0x28   :  { %p1179_p2 = scmp.ne.s32.totalorder %s1571_s2, %s1178_s22  ;;  %p1182_p3 = scmp.lt.u32.totalorder %s1178_s22, %s1571_s2 }
  0x2a   :  { %p1184_p4 = pnand %p1182_p3, %p1179_p2 }
  0x2c   :  { %1187 = shalt.err (!%p1184_p4)
}
  0x2d   :  { %s1188_s0 = scalar_lea.vmem %s44_s17, 32  ;;  %p1193_p6 = scmp.lt.s32.totalorder %s44_s17, %s44_s17 }
  0x2e   :  { %p1189_p5 = scmp.ne.s32.totalorder %s44_s17, %s1188_s0  ;;  %p1194_p7 = scmp.lt.s32.totalorder %s1188_s0, %s1188_s0 }
  0x30   :  { %p1195_p8 = por %p1194_p7, %p1193_p6 }
  0x32   :  { %p1196_p9 = pnand %p1195_p8, %p1189_p5 }
  0x34   :  { %1199 = shalt.err (!%p1196_p9)
}
  0x35   :  { %46 = dma.hbm_to_vmem [thread:$0]  %s1571_s2, 32, %s44_s17, [#allocation6]  }
  0x36   :  { %s1200_s5 = scalar_lea.hbm %s1572_s3, 16384 }
  0x37   :  { %p1201_p10 = scmp.ne.s32.totalorder %s1572_s3, %s1200_s5  ;;  %p1204_p11 = scmp.lt.u32.totalorder %s1200_s5, %s1572_s3 }
  0x39   :  { %p1206_p12 = pnand %p1204_p11, %p1201_p10 }
  0x3b   :  { %1209 = shalt.err (!%p1206_p12)
}
  0x3c   :  { %s1210_s10 = scalar_lea.vmem %s1317_s19, 16384  ;;  %p1215_p0 = scmp.lt.s32.totalorder %s1317_s19, %s1317_s19 }
  0x3d   :  { %p1211_p13 = scmp.ne.s32.totalorder %s1317_s19, %s1210_s10  ;;  %p1216_p1 = scmp.lt.s32.totalorder %s1210_s10, %s1210_s10 }
  0x3f   :  { %p1217_p2 = por %p1216_p1, %p1215_p0 }
  0x41   :  { %p1218_p3 = pnand %p1217_p2, %p1211_p13 }
  0x43   :  { %1221 = shalt.err (!%p1218_p3)
}
  0x44   :  { %58 = dma.hbm_to_vmem [thread:$0]  %s1572_s3, 16384, %s1317_s19, [#allocation9], %s1256_s1, %s1256_s1, %s1257_s13  }
  0x45   :  { %1244 = dma.done.wait [#allocation3], 2048  }
  0x46   :  { %1245 = vsyncadd [#allocation3], 4294965248 }
  0x47   :  { %1246 = dma.done.wait [#allocation6], 544  }
  0x48   :  { %1247 = vsyncadd [#allocation6], 4294966752 }
  0x49   :  { %1248 = dma.done.wait [#allocation9], 16384  }
  0x4a   :  { %1249 = vsyncadd [#allocation9], 4294950912  ;;  %v1351_v0 = vld [vmem:[#allocation2 + $0x40] sm:$0xff]  ;;  %v1353_v1 = vld [vmem:[#allocation2 + $0x48] sm:$0xff]  ;;  %v1260_v35 = vmov 0.0|0.0   ;;  %vm1261_vm0 = vmmov 0   ;;  %v152_v45 = vlaneseq }
  0x4b   :  { %v1355_v2 = vld [vmem:[#allocation2] sm:$0xff]  ;;  %v123_v3 = vadd.f32 %v1353_v1, %v1351_v0  ;;  %v1359_v4 = vld [vmem:[#allocation2 + $0x8] sm:$0xff]  ;;  %v1361_v5 = vld [vmem:[#allocation2 + $0x50] sm:$0xff]  ;;  %v99_v21 = vmax.f32 %v1351_v0, %v1353_v1  ;;  %973 = vmatprep.subr.bf16.mxu0 %v1260_v35  ;;  %v1262_v39 = vmov 0.0   ;;  %vm163_vm1 = vcmask 130112   ;;  %s1264_s3 = smov [#allocation10]  }
  0x4c   :  { %v1363_v6 = vld [vmem:[#allocation2 + $0x58] sm:$0xff]  ;;  %v111_v7 = vadd.f32 %v1359_v4, %v1355_v2  ;;  %v1367_v8 = vld [vmem:[#allocation2 + $0x10] sm:$0xff]  ;;  %v1375_v12 = vld [vmem:[#allocation2 + $0x60] sm:$0xff]  ;;  %v87_v19 = vmax.f32 %v1355_v2, %v1359_v4  ;;  %965 = vmatprep.mubr.msk.f32.mxu0 %vm1261_vm0, %v1262_v39  ;;  %968 = vmatprep.subr.mxu1 %v1262_v39  ;;  %v153_v48 = vand.u32 127, %v152_v45  ;;  %v1415_v50 = vshrl.u32 %v152_v45, 7  ;;  %s930_s12 = sshll.u32 %s1264_s3, 4  ;;  %s931_s12 = int_to_ptr.vmem [resolvable:$true] %s930_s12 }
  0x4d   :  { %v1369_v9 = vld [vmem:[#allocation2 + $0x18] sm:$0xff]  ;;  %124 = vadd.xlane.f32.xlu1 %v123_v3  ;;  %v126_v10 = vadd.f32 %v1363_v6, %v1361_v5  ;;  %v1377_v13 = vld [vmem:[#allocation2 + $0x68] sm:$0xff]  ;;  %v1379_v14 = vld [vmem:[#allocation2 + $0x20] sm:$0xff]  ;;  %v102_v20 = vmax.f32 %v1361_v5, %v1363_v6  ;;  %970 = vmatprep.mubr.msk.f32.mxu1 %vm1261_vm0, %v1262_v39  ;;  %vm170_vm2 = vcmask 195712   ;;  %vm177_vm3 = vcmask 261312   ;;  %s1222_s14 = scalar_lea.vmem %s931_s12, 2048  ;;  %p1227_p5 = scmp.lt.s32.totalorder %s931_s12, %s931_s12 }
  0x4e   :  { %112 = vadd.xlane.f32.xlu0 %v111_v7  ;;  %v114_v11 = vadd.f32 %v1369_v9, %v1367_v8  ;;  %v1381_v15 = vld [vmem:[#allocation2 + $0x28] sm:$0xff]  ;;  %v129_v16 = vadd.f32 %v1377_v13, %v1375_v12  ;;  %v90_v18 = vmax.f32 %v1367_v8, %v1369_v9  ;;  %v1395_v22 = vld [vmem:[#allocation2 + $0x70] sm:$0xff]  ;;  %v1397_v23 = vld [vmem:[#allocation2 + $0x78] sm:$0xff]  ;;  %v105_v28 = vmax.f32 %v1375_v12, %v1377_v13  ;;  %p1223_p4 = scmp.ne.s32.totalorder %s931_s12, %s1222_s14  ;;  %p1228_p6 = scmp.lt.s32.totalorder %s1222_s14, %s1222_s14 }
  0x4f   :  { %v117_v17 = vadd.f32 %v1381_v15, %v1379_v14  ;;  %v1399_v24 = vld [vmem:[#allocation2 + $0x30] sm:$0xff]  ;;  %v1401_v25 = vld [vmem:[#allocation2 + $0x38] sm:$0xff]  ;;  %v132_v26 = vadd.f32 %v1397_v23, %v1395_v22  ;;  %v93_v29 = vmax.f32 %v1379_v14, %v1381_v15  ;;  %v108_v30 = vmax.f32 %v1395_v22, %v1397_v23  ;;  %v252_v32 = vld [vmem:[#allocation5] sm:$0xff] }
  0x50   :  { %v120_v27 = vadd.f32 %v1401_v25, %v1399_v24  ;;  %v96_v31 = vmax.f32 %v1399_v24, %v1401_v25  ;;  %v253_v33 = vld [vmem:[#allocation5 + $0x8] sm:$0xff]  ;;  %v254_v36 = vld [vmem:[#allocation5 + $0x10] sm:$0xff]  ;;  %v255_v37 = vld [vmem:[#allocation5 + $0x18] sm:$0xff]  ;;  %v158_v51 = vadd.s32 4294967288, %v153_v48  ;;  %v165_v52 = vadd.s32 4294967280, %v153_v48  ;;  %p1229_p7 = por %p1228_p6, %p1227_p5 }
  0x51   :  { %127 = vadd.xlane.f32.xlu1 %v126_v10  ;;  %v974_v34 = vpack.c.bf16 %v253_v33, %v252_v32  ;;  %v977_v38 = vpack.c.bf16 %v255_v37, %v254_v36  ;;  %v172_v55 = vadd.s32 4294967272, %v153_v48  ;;  %v156_v56 = vsub.s32 %v153_v48, %v1415_v50 }
  0x52   :  { %115 = vadd.xlane.f32.xlu0 %v114_v11  ;;  %v161_v57 = vsub.s32 %v158_v51, %v1415_v50  ;;  %v168_v59 = vsub.s32 %v165_v52, %v1415_v50  ;;  %vm198_vm4 = vcmask 1041409   ;;  %vm247_vm5 = vcmask 1043459   ;;  %p1230_p8 = pnand %p1229_p7, %p1223_p4 }
  0x53   :  { %975 = vmatpush3.bf16.msra.mxu0 %v974_v34  ;;  %v175_v11 = vsub.s32 %v172_v55, %v1415_v50  ;;  %vm250_vm6 = vcmask 1041408   ;;  %vm256_vm7 = vcmask 261120   ;;  %vm332_vm8 = vcmask 15360  }
  0x54   :  { %976 = vmatprep.subr.bf16.mxu0 %v1260_v35 }
  0x55   :  { %130 = vadd.xlane.f32.xlu1 %v129_v16 }
  0x56   :  { %118 = vadd.xlane.f32.xlu0 %v117_v17 }
  0x57   :  { %978 = vmatpush3.bf16.msra.mxu0 %v977_v38 }
  0x59   :  { %91 = vmax.xlane.f32.xlu1 %v90_v18 }
  0x5a   :  { %88 = vmax.xlane.f32.xlu0 %v87_v19 }
  0x5d   :  { %103 = vmax.xlane.f32.xlu1 %v102_v20 }
  0x5e   :  { %100 = vmax.xlane.f32.xlu0 %v99_v21 }
  0x61   :  { %133 = vadd.xlane.f32.xlu1 %v132_v26 }
  0x62   :  { %121 = vadd.xlane.f32.xlu0 %v120_v27 }
  0x65   :  { %106 = vmax.xlane.f32.xlu1 %v105_v28 }
  0x66   :  { %94 = vmax.xlane.f32.xlu0 %v93_v29 }
  0x69   :  { %109 = vmax.xlane.f32.xlu1 %v108_v30 }
  0x6a   :  { %97 = vmax.xlane.f32.xlu0 %v96_v31 }
  0xda   :  { %v125_v40 = vpop.xlane.xlu1 %124 }
  0xdb   :  { %v113_v41 = vpop.xlane.xlu0 %112  ;;  %v140_v60 = vmul.f32 0.00390625, %v125_v40 }
  0xdc   :  { %v136_v10 = vmul.f32 0.00390625, %v113_v41 }
  0xdd   :  { %v231_v19 = vrot.slane %v140_v60, %v156_v56 }
  0xde   :  { %v128_v42 = vpop.xlane.xlu1 %127  ;;  %v212_v33 = vrot.slane %v136_v10, %v156_v56  ;;  %v568_v10 = vld [vmem:[#allocation8 + $0x10] sm:$0xff] }
  0xdf   :  { %v116_v43 = vpop.xlane.xlu0 %115  ;;  %v141_v58 = vmul.f32 0.00390625, %v128_v42 }
  0xe0   :  { %v137_v61 = vmul.f32 0.00390625, %v116_v43 }
  0xe1   :  { %v235_v18 = vrot.slane %v141_v58, %v161_v57  ;;  %v331_v58 = vld [vmem:[#allocation7] sm:$0x3] }
  0xe2   :  { %v131_v44 = vpop.xlane.xlu1 %130  ;;  %v216_v20 = vrot.slane %v137_v61, %v161_v57  ;;  %969 = vmatpush3.msk.msra.mxu1 %vm250_vm6, %v331_v58 }
  0xe3   :  { %v119_v46 = vpop.xlane.xlu0 %118  ;;  %v142_v62 = vmul.f32 0.00390625, %v131_v44  ;;  %v236_v37 = vsel %vm163_vm1, %v235_v18, %v231_v19  ;;  %v630_v19 = vld [vmem:[#allocation8 + $0x200] sm:$0xff] }
  0xe4   :  { %v138_v63 = vmul.f32 0.00390625, %v119_v46  ;;  %v217_v39 = vsel %vm163_vm1, %v216_v20, %v212_v33  ;;  %v632_v20 = vld [vmem:[#allocation8 + $0x210] sm:$0xff]  ;;  %v637_v33 = vld [vmem:[#allocation8 + $0x238] sm:$0xff] }
  0xe5   :  { %v240_v21 = vrot.slane %v142_v62, %v168_v59  ;;  %v567_v62 = vld [vmem:[#allocation8 + $0x8] sm:$0xff] }
  0xe6   :  { %v92_v47 = vpop.xlane.xlu1 %91  ;;  %v221_v26 = vrot.slane %v138_v63, %v168_v59  ;;  %v569_v63 = vld [vmem:[#allocation8 + $0x18] sm:$0xff] }
  0xe7   :  { %v89_v49 = vpop.xlane.xlu0 %88  ;;  %v162_v28 = vrot.slane %v92_v47, %v161_v57  ;;  %v241_v40 = vsel %vm170_vm2, %v240_v21, %v236_v37  ;;  %v571_v21 = vld [vmem:[#allocation8 + $0x28] sm:$0xff] }
  0xe8   :  { %v157_v29 = vrot.slane %v89_v49, %v156_v56  ;;  %v222_v42 = vsel %vm170_vm2, %v221_v26, %v217_v39  ;;  %v1045_v26 = vpack.c.bf16 %v632_v20, %v630_v19  ;;  %v575_v37 = vld [vmem:[#allocation8 + $0x48] sm:$0xff]  ;;  %v648_v20 = vld [vmem:[#allocation8 + $0x290] sm:$0xff] }
  0xea   :  { %v104_v53 = vpop.xlane.xlu1 %103  ;;  %v164_v43 = vsel %vm163_vm1, %v162_v28, %v157_v29  ;;  %v570_v28 = vld [vmem:[#allocation8 + $0x20] sm:$0xff]  ;;  %v572_v29 = vld [vmem:[#allocation8 + $0x30] sm:$0xff] }
  0xeb   :  { %v101_v54 = vpop.xlane.xlu0 %100  ;;  %v186_v30 = vrot.slane %v104_v53, %v161_v57 }
  0xec   :  { %v182_v31 = vrot.slane %v101_v54, %v156_v56 }
  0xee   :  { %v134_v3 = vpop.xlane.xlu1 %133  ;;  %v187_v44 = vsel %vm163_vm1, %v186_v30, %v182_v31  ;;  %v985_v31 = vpack.c.bf16 %v572_v29, %v570_v28  ;;  %v653_v28 = vld [vmem:[#allocation8 + $0x2b8] sm:$0xff] }
  0xef   :  { %v122_v7 = vpop.xlane.xlu0 %121  ;;  %v143_v16 = vmul.f32 0.00390625, %v134_v3  ;;  %v566_v3 = vld [vmem:[#allocation8] sm:$0xff] }
  0xf0   :  { %v139_v17 = vmul.f32 0.00390625, %v122_v7  ;;  %v979_v7 = vpack.c.bf16 %v569_v63, %v567_v62  ;;  %v585_v62 = vld [vmem:[#allocation8 + $0x98] sm:$0xff] }
  0xf1   :  { %v245_v34 = vrot.slane %v143_v16, %v175_v11  ;;  %v633_v16 = vld [vmem:[#allocation8 + $0x218] sm:$0xff] }
  0xf2   :  { %v107_v27 = vpop.xlane.xlu1 %106  ;;  %v226_v35 = vrot.slane %v139_v17, %v175_v11  ;;  %v981_v17 = vpack.c.bf16 %v568_v10, %v566_v3  ;;  %980 = vmatprep.subr.bf16.mxu0 %v979_v7  ;;  %v647_v3 = vld [vmem:[#allocation8 + $0x288] sm:$0xff]  ;;  %v649_v7 = vld [vmem:[#allocation8 + $0x298] sm:$0xff] }
  0xf3   :  { %v95_v32 = vpop.xlane.xlu0 %94  ;;  %v191_v36 = vrot.slane %v107_v27, %v168_v59  ;;  %v246_v47 = vsel %vm177_vm3, %v245_v34, %v241_v40  ;;  %v573_v27 = vld [vmem:[#allocation8 + $0x38] sm:$0xff]  ;;  %v634_v34 = vld [vmem:[#allocation8 + $0x220] sm:$0xff]  ;;  %v1059_v19 = vpack.c.bf16 %v649_v7, %v647_v3  ;;  %v659_v3 = vld [vmem:[#allocation8 + $0x2e8] sm:$0xff] }
  0xf4   :  { %v169_v38 = vrot.slane %v95_v32, %v168_v59  ;;  %v227_v48 = vsel %vm177_vm3, %v226_v35, %v222_v42  ;;  %v983_v30 = vpack.c.bf16 %v573_v27, %v571_v21  ;;  %v635_v32 = vld [vmem:[#allocation8 + $0x228] sm:$0xff]  ;;  %v576_v42 = vld [vmem:[#allocation8 + $0x50] sm:$0xff]  ;;  %v661_v7 = vld [vmem:[#allocation8 + $0x2f8] sm:$0xff] }
  0xf5   :  { %v192_v49 = vsel %vm170_vm2, %v191_v36, %v187_v44  ;;  %v248_v56 = vsel %vm247_vm5, %v246_v47, %v227_v48  ;;  %v1047_v35 = vpack.c.bf16 %v637_v33, %v635_v32  ;;  %v636_v36 = vld [vmem:[#allocation8 + $0x230] sm:$0xff]  ;;  %v641_v44 = vld [vmem:[#allocation8 + $0x258] sm:$0xff]  ;;  %v587_v21 = vld [vmem:[#allocation8 + $0xa8] sm:$0xff] }
  0xf6   :  { %v110_v41 = vpop.xlane.xlu1 %109  ;;  %v171_v52 = vsel %vm170_vm2, %v169_v38, %v164_v43  ;;  %v577_v38 = vld [vmem:[#allocation8 + $0x58] sm:$0xff]  ;;  %v1049_v39 = vpack.c.bf16 %v636_v36, %v634_v34  ;;  %v639_v43 = vld [vmem:[#allocation8 + $0x248] sm:$0xff]  ;;  %v586_v32 = vld [vmem:[#allocation8 + $0xa0] sm:$0xff] }
  0xf7   :  { %v196_v45 = vrot.slane %v110_v41, %v175_v11  ;;  %v98_v46 = vpop.xlane.xlu0 %97  ;;  %v987_v40 = vpack.c.bf16 %v577_v38, %v575_v37  ;;  %v574_v41 = vld [vmem:[#allocation8 + $0x40] sm:$0xff]  ;;  %v1051_v48 = vpack.c.bf16 %v641_v44, %v639_v43  ;;  %v651_v27 = vld [vmem:[#allocation8 + $0x2a8] sm:$0xff]  ;;  %v588_v33 = vld [vmem:[#allocation8 + $0xb0] sm:$0xff] }
  0xf8   :  { %v176_v51 = vrot.slane %v98_v46, %v175_v11  ;;  %v631_v11 = vld [vmem:[#allocation8 + $0x208] sm:$0xff]  ;;  %v640_v46 = vld [vmem:[#allocation8 + $0x250] sm:$0xff]  ;;  %v989_v47 = vpack.c.bf16 %v576_v42, %v574_v41  ;;  %v650_v34 = vld [vmem:[#allocation8 + $0x2a0] sm:$0xff]  ;;  %v1001_v41 = vpack.c.bf16 %v588_v33, %v586_v32 }
  0xf9   :  { %v197_v53 = vsel %vm177_vm3, %v196_v45, %v192_v49  ;;  %v1043_v18 = vpack.c.bf16 %v633_v16, %v631_v11  ;;  %v638_v45 = vld [vmem:[#allocation8 + $0x240] sm:$0xff]  ;;  %v579_v49 = vld [vmem:[#allocation8 + $0x68] sm:$0xff]  ;;  %v652_v36 = vld [vmem:[#allocation8 + $0x2b0] sm:$0xff] }
  0xfa   :  { %v178_v54 = vsel %vm177_vm3, %v176_v51, %v171_v52  ;;  %v581_v51 = vld [vmem:[#allocation8 + $0x78] sm:$0xff]  ;;  %v578_v52 = vld [vmem:[#allocation8 + $0x60] sm:$0xff]  ;;  %v591_v37 = vld [vmem:[#allocation8 + $0xc8] sm:$0xff]  ;;  %v1065_v42 = vpack.c.bf16 %v652_v36, %v650_v34 }
  0xfb   :  { %v199_v55 = vsel %vm198_vm4, %v197_v53, %v178_v54  ;;  %1044 = vmatprep.subr.bf16.mxu1 %v1043_v18  ;;  %v1053_v53 = vpack.c.bf16 %v640_v46, %v638_v45  ;;  %v991_v54 = vpack.c.bf16 %v581_v51, %v579_v49  ;;  %v582_v16 = vld [vmem:[#allocation8 + $0x80] sm:$0xff]  ;;  %v593_v38 = vld [vmem:[#allocation8 + $0xd8] sm:$0xff]  ;;  %v592_v45 = vld [vmem:[#allocation8 + $0xd0] sm:$0xff] }
  0xfc   :  { %v251_v57 = vsel %vm250_vm6, %v199_v55, %v248_v56  ;;  %v580_v55 = vld [vmem:[#allocation8 + $0x70] sm:$0xff]  ;;  %v643_v56 = vld [vmem:[#allocation8 + $0x268] sm:$0xff]  ;;  %v646_v18 = vld [vmem:[#allocation8 + $0x280] sm:$0xff]  ;;  %v1003_v43 = vpack.c.bf16 %v593_v38, %v591_v37 }
  0xfd   :  { %966 = vmatmul.mubr.msk.f32.vlgmr.msra.gmra.mrb[0].mxu0 %vm256_vm7, %v251_v57  ;;  %v645_v57 = vld [vmem:[#allocation8 + $0x278] sm:$0xff]  ;;  %v993_v63 = vpack.c.bf16 %v580_v55, %v578_v52  ;;  %v590_v44 = vld [vmem:[#allocation8 + $0xc0] sm:$0xff]  ;;  %v595_v49 = vld [vmem:[#allocation8 + $0xe8] sm:$0xff] }
  0xfe   :  { %982 = vmatpush1.bf16.msra.mxu0 %v981_v17  ;;  %v1055_v58 = vpack.c.bf16 %v645_v57, %v643_v56  ;;  %v584_v17 = vld [vmem:[#allocation8 + $0x90] sm:$0xff]  ;;  %v654_v46 = vld [vmem:[#allocation8 + $0x2c0] sm:$0xff]  ;;  %v597_v51 = vld [vmem:[#allocation8 + $0xf8] sm:$0xff]  ;;  %v1005_v52 = vpack.c.bf16 %v592_v45, %v590_v44 }
  0xff   :  { %984 = vmatprep.subr.bf16.mxu0 %v983_v30  ;;  %v997_v29 = vpack.c.bf16 %v584_v17, %v582_v16  ;;  %v1061_v30 = vpack.c.bf16 %v648_v20, %v646_v18  ;;  %v594_v55 = vld [vmem:[#allocation8 + $0xe0] sm:$0xff]  ;;  %v596_v56 = vld [vmem:[#allocation8 + $0xf0] sm:$0xff]  ;;  %v601_v20 = vld [vmem:[#allocation8 + $0x118] sm:$0xff] }
 0x100   :  { %v1009_v57 = vpack.c.bf16 %v596_v56, %v594_v55  ;;  %v658_v16 = vld [vmem:[#allocation8 + $0x2e0] sm:$0xff]  ;;  %v660_v17 = vld [vmem:[#allocation8 + $0x2f0] sm:$0xff]  ;;  %v605_v36 = vld [vmem:[#allocation8 + $0x138] sm:$0xff] }
 0x101   :  { %v1073_v18 = vpack.c.bf16 %v660_v17, %v658_v16  ;;  %v662_v32 = vld [vmem:[#allocation8 + $0x300] sm:$0xff]  ;;  %v664_v33 = vld [vmem:[#allocation8 + $0x310] sm:$0xff]  ;;  %v671_v56 = vld [vmem:[#allocation8 + $0x348] sm:$0xff] }
 0x102   :  { %986 = vmatpush1.bf16.msra.mxu0 %v985_v31  ;;  %v1077_v34 = vpack.c.bf16 %v664_v33, %v662_v32  ;;  %v602_v38 = vld [vmem:[#allocation8 + $0x120] sm:$0xff]  ;;  %v612_v16 = vld [vmem:[#allocation8 + $0x170] sm:$0xff] }
 0x103   :  { %988 = vmatprep.subr.bf16.mxu0 %v987_v40  ;;  %v657_v40 = vld [vmem:[#allocation8 + $0x2d8] sm:$0xff]  ;;  %v666_v45 = vld [vmem:[#allocation8 + $0x320] sm:$0xff]  ;;  %v616_v33 = vld [vmem:[#allocation8 + $0x190] sm:$0xff] }
 0x104   :  { %v614_v32 = vld [vmem:[#allocation8 + $0x180] sm:$0xff] }
 0x106   :  { %990 = vmatpush1.bf16.msra.mxu0 %v989_v47 }
 0x107   :  { %992 = vmatprep.subr.bf16.mxu0 %v991_v54  ;;  %v1007_v54 = vpack.c.bf16 %v597_v51, %v595_v49  ;;  %v609_v49 = vld [vmem:[#allocation8 + $0x158] sm:$0xff] }
 0x10a   :  { %994 = vmatpush1.bf16.msra.mxu0 %v993_v63 }
 0x1d0   :  { %v326_v59 = vpop.f32.mrb[0].mxu0 }
 0x1d1   :  { %v330_v60 = vmax.f32 %v326_v59, 0.0  ;;  %v967_v61 = vpop.f32.mrb[1].mxu0  ;;  %v642_v59 = vld [vmem:[#allocation8 + $0x260] sm:$0xff] }
 0x1d2   :  { %v583_v61 = vld [vmem:[#allocation8 + $0x88] sm:$0xff] }
 0x1d3   :  { %971 = vmatmul.mubr.msk.f32.vlgmr.msra.gmra.mrb[0].mxu1 %vm332_vm8, %v330_v60  ;;  %v644_v60 = vld [vmem:[#allocation8 + $0x270] sm:$0xff]  ;;  %v995_v11 = vpack.c.bf16 %v585_v62, %v583_v61 }
 0x1d4   :  { %1046 = vmatpush1.bf16.msra.mxu1 %v1045_v26  ;;  %v1057_v10 = vpack.c.bf16 %v644_v60, %v642_v59  ;;  %v589_v26 = vld [vmem:[#allocation8 + $0xb8] sm:$0xff] }
 0x1d5   :  { %1048 = vmatprep.subr.bf16.mxu1 %v1047_v35  ;;  %996 = vmatprep.subr.bf16.mxu0 %v995_v11  ;;  %v999_v31 = vpack.c.bf16 %v589_v26, %v587_v21  ;;  %v1063_v35 = vpack.c.bf16 %v653_v28, %v651_v27  ;;  %v1071_v11 = vpack.c.bf16 %v661_v7, %v659_v3  ;;  %v598_v26 = vld [vmem:[#allocation8 + $0x100] sm:$0xff]  ;;  %v600_v27 = vld [vmem:[#allocation8 + $0x110] sm:$0xff]  ;;  %v611_v3 = vld [vmem:[#allocation8 + $0x168] sm:$0xff] }
 0x1d6   :  { %998 = vmatpush1.bf16.msra.mxu0 %v997_v29  ;;  %v1013_v28 = vpack.c.bf16 %v600_v27, %v598_v26  ;;  %v663_v29 = vld [vmem:[#allocation8 + $0x308] sm:$0xff]  ;;  %v613_v7 = vld [vmem:[#allocation8 + $0x178] sm:$0xff]  ;;  %v674_v26 = vld [vmem:[#allocation8 + $0x360] sm:$0xff] }
 0x1d7   :  { %1000 = vmatprep.subr.bf16.mxu0 %v999_v31  ;;  %v676_v27 = vld [vmem:[#allocation8 + $0x370] sm:$0xff] }
 0x1d8   :  { %1050 = vmatpush1.bf16.msra.mxu1 %v1049_v39  ;;  %v655_v39 = vld [vmem:[#allocation8 + $0x2c8] sm:$0xff] }
 0x1d9   :  { %1052 = vmatprep.subr.bf16.mxu1 %v1051_v48  ;;  %v1067_v47 = vpack.c.bf16 %v657_v40, %v655_v39  ;;  %v656_v48 = vld [vmem:[#allocation8 + $0x2d0] sm:$0xff] }
 0x1da   :  { %1002 = vmatpush1.bf16.msra.mxu0 %v1001_v41  ;;  %v604_v39 = vld [vmem:[#allocation8 + $0x130] sm:$0xff]  ;;  %v667_v41 = vld [vmem:[#allocation8 + $0x328] sm:$0xff] }
 0x1db   :  { %1004 = vmatprep.subr.bf16.mxu0 %v1003_v43  ;;  %v1017_v40 = vpack.c.bf16 %v604_v39, %v602_v38  ;;  %v1436_v43 = vsub.s32 0, %v1415_v50  ;;  %v678_v38 = vld [vmem:[#allocation8 + $0x380] sm:$0xff]  ;;  %v680_v39 = vld [vmem:[#allocation8 + $0x390] sm:$0xff] }
 0x1dc   :  { %1054 = vmatpush1.bf16.msra.mxu1 %v1053_v53  ;;  %v1069_v53 = vpack.c.bf16 %v656_v48, %v654_v46  ;;  %v668_v46 = vld [vmem:[#allocation8 + $0x330] sm:$0xff]  ;;  %v607_v48 = vld [vmem:[#allocation8 + $0x148] sm:$0xff] }
 0x1dd   :  { %1056 = vmatprep.subr.bf16.mxu1 %v1055_v58  ;;  %v1019_v51 = vpack.c.bf16 %v609_v49, %v607_v48  ;;  %v683_v48 = vld [vmem:[#allocation8 + $0x3a8] sm:$0xff]  ;;  %v685_v49 = vld [vmem:[#allocation8 + $0x3b8] sm:$0xff] }
 0x1de   :  { %1006 = vmatpush1.bf16.msra.mxu0 %v1005_v52  ;;  %v606_v52 = vld [vmem:[#allocation8 + $0x140] sm:$0xff] }
 0x1df   :  { %1008 = vmatprep.subr.bf16.mxu0 %v1007_v54 }
 0x1e0   :  { %1058 = vmatpush1.bf16.msra.mxu1 %v1057_v10 }
 0x1e1   :  { %1060 = vmatprep.subr.bf16.mxu1 %v1059_v19  ;;  %v599_v19 = vld [vmem:[#allocation8 + $0x108] sm:$0xff] }
 0x1e2   :  { %1010 = vmatpush1.bf16.msra.mxu0 %v1009_v57  ;;  %v1011_v21 = vpack.c.bf16 %v601_v20, %v599_v19  ;;  %v673_v57 = vld [vmem:[#allocation8 + $0x358] sm:$0xff] }
 0x1e3   :  { %v677_v19 = vld [vmem:[#allocation8 + $0x378] sm:$0xff] }
 0x1e4   :  { %1062 = vmatpush1.bf16.msra.mxu1 %v1061_v30  ;;  %v665_v30 = vld [vmem:[#allocation8 + $0x318] sm:$0xff]  ;;  %1012 = vmatprep.subr.bf16.mxu0 %v1011_v21 }
 0x1e5   :  { %1064 = vmatprep.subr.bf16.mxu1 %v1063_v35  ;;  %v1075_v31 = vpack.c.bf16 %v665_v30, %v663_v29  ;;  %v603_v35 = vld [vmem:[#allocation8 + $0x128] sm:$0xff]  ;;  %v617_v30 = vld [vmem:[#allocation8 + $0x198] sm:$0xff] }
 0x1e6   :  { %1014 = vmatpush1.bf16.msra.mxu0 %v1013_v28  ;;  %v1015_v37 = vpack.c.bf16 %v605_v36, %v603_v35  ;;  %v1089_v28 = vpack.c.bf16 %v676_v27, %v674_v26  ;;  %v615_v29 = vld [vmem:[#allocation8 + $0x188] sm:$0xff]  ;;  %v681_v36 = vld [vmem:[#allocation8 + $0x398] sm:$0xff] }
 0x1e7   :  { %v679_v35 = vld [vmem:[#allocation8 + $0x388] sm:$0xff] }
 0x1e8   :  { %1066 = vmatpush1.bf16.msra.mxu1 %v1065_v42  ;;  %1016 = vmatprep.subr.bf16.mxu0 %v1015_v37  ;;  %v669_v42 = vld [vmem:[#allocation8 + $0x338] sm:$0xff]  ;;  %v1091_v37 = vpack.c.bf16 %v681_v36, %v679_v35  ;;  %v691_v26 = vld [vmem:[#allocation8 + $0x3e8] sm:$0xff] }
 0x1e9   :  { %1068 = vmatprep.subr.bf16.mxu1 %v1067_v47  ;;  %v1079_v44 = vpack.c.bf16 %v669_v42, %v667_v41  ;;  %v1081_v47 = vpack.c.bf16 %v668_v46, %v666_v45  ;;  %v619_v41 = vld [vmem:[#allocation8 + $0x1a8] sm:$0xff]  ;;  %v621_v42 = vld [vmem:[#allocation8 + $0x1b8] sm:$0xff]  ;;  %v618_v45 = vld [vmem:[#allocation8 + $0x1a0] sm:$0xff] }
 0x1ea   :  { %1018 = vmatpush1.bf16.msra.mxu0 %v1017_v40  ;;  %v1093_v40 = vpack.c.bf16 %v680_v39, %v678_v38  ;;  %v620_v46 = vld [vmem:[#allocation8 + $0x1b0] sm:$0xff] }
 0x1eb   :  { %1020 = vmatprep.subr.bf16.mxu0 %v1019_v51  ;;  %v1095_v51 = vpack.c.bf16 %v685_v49, %v683_v48 }
 0x1ec   :  { %1070 = vmatpush1.bf16.msra.mxu1 %v1069_v53  ;;  %v608_v53 = vld [vmem:[#allocation8 + $0x150] sm:$0xff] }
 0x1ed   :  { %1072 = vmatprep.subr.bf16.mxu1 %v1071_v11  ;;  %v1021_v55 = vpack.c.bf16 %v608_v53, %v606_v52  ;;  %v610_v11 = vld [vmem:[#allocation8 + $0x160] sm:$0xff]  ;;  %v684_v53 = vld [vmem:[#allocation8 + $0x3b0] sm:$0xff] }
 0x1ee   :  { %v1025_v17 = vpack.c.bf16 %v612_v16, %v610_v11  ;;  %v682_v52 = vld [vmem:[#allocation8 + $0x3a0] sm:$0xff]  ;;  %v627_v11 = vld [vmem:[#allocation8 + $0x1e8] sm:$0xff]  ;;  %v629_v16 = vld [vmem:[#allocation8 + $0x1f8] sm:$0xff] }
 0x1ef   :  { %1022 = vmatpush1.bf16.msra.mxu0 %v1021_v55  ;;  %v623_v55 = vld [vmem:[#allocation8 + $0x1c8] sm:$0xff] }
 0x1f0   :  { %1074 = vmatpush1.bf16.msra.mxu1 %v1073_v18  ;;  %v675_v18 = vld [vmem:[#allocation8 + $0x368] sm:$0xff] }
 0x1f1   :  { %1076 = vmatprep.subr.bf16.mxu1 %v1075_v31  ;;  %v1087_v21 = vpack.c.bf16 %v677_v19, %v675_v18  ;;  %v1027_v31 = vpack.c.bf16 %v617_v30, %v615_v29  ;;  %v1039_v18 = vpack.c.bf16 %v629_v16, %v627_v11  ;;  %v626_v19 = vld [vmem:[#allocation8 + $0x1e0] sm:$0xff] }
 0x1f2   :  { %v690_v30 = vld [vmem:[#allocation8 + $0x3e0] sm:$0xff] }
 0x1f4   :  { %1078 = vmatpush1.bf16.msra.mxu1 %v1077_v34  ;;  %v1029_v34 = vpack.c.bf16 %v616_v33, %v614_v32 }
 0x1f5   :  { %1080 = vmatprep.subr.bf16.mxu1 %v1079_v44  ;;  %v1031_v44 = vpack.c.bf16 %v621_v42, %v619_v41 }
 0x1f8   :  { %1082 = vmatpush1.bf16.msra.mxu1 %v1081_v47  ;;  %v1033_v47 = vpack.c.bf16 %v620_v46, %v618_v45 }
 0x2a6   :  { %v405_v58 = vpop.f32.mrb[0].mxu1 }
 0x2a7   :  { %v410_v59 = vrot.slane %v405_v58, 2  ;;  %v972_v60 = vpop.f32.mrb[1].mxu1 }
 0x2a8   :  { %v1083_v60 = vpack.c.bf16 %v673_v57, %v671_v56  ;;  %v625_v56 = vld [vmem:[#allocation8 + $0x1d8] sm:$0xff] }
 0x2a9   :  { %v412_v61 = vadd.f32 %v410_v59, %v405_v58  ;;  %v1440_v59 = vsub.s32 1, %v1415_v50  ;;  %v1035_v57 = vpack.c.bf16 %v625_v56, %v623_v55 }
 0x2aa   :  { %1084 = vmatprep.subr.bf16.mxu1 %v1083_v60  ;;  %v624_v60 = vld [vmem:[#allocation8 + $0x1d0] sm:$0xff] }
 0x2ab   :  { %v947_v62 = vmul.f32 -1.442695, %v412_v61  ;;  %v670_v61 = vld [vmem:[#allocation8 + $0x340] sm:$0xff] }
 0x2ad   :  { %1122 = vpow2.f32 %v947_v62  ;;  %v672_v62 = vld [vmem:[#allocation8 + $0x350] sm:$0xff] }
 0x2b7   :  { %v1123_v63 = vpop.eup %1122 }
 0x2b8   :  { %v416_v10 = vadd.f32 1.0, %v1123_v63  ;;  %v1085_v63 = vpack.c.bf16 %v672_v62, %v670_v61  ;;  %v687_v62 = vld [vmem:[#allocation8 + $0x3c8] sm:$0xff] }
 0x2ba   :  { %1124 = vrcp.f32 %v416_v10  ;;  %v1023_v10 = vpack.c.bf16 %v613_v7, %v611_v3  ;;  %1086 = vmatpush1.bf16.msra.mxu1 %v1085_v63  ;;  %v689_v63 = vld [vmem:[#allocation8 + $0x3d8] sm:$0xff]  ;;  %v686_v3 = vld [vmem:[#allocation8 + $0x3c0] sm:$0xff] }
 0x2bb   :  { %1088 = vmatprep.subr.bf16.mxu1 %v1087_v21  ;;  %v1099_v7 = vpack.c.bf16 %v689_v63, %v687_v62  ;;  %v628_v21 = vld [vmem:[#allocation8 + $0x1f0] sm:$0xff] }
 0x2bc   :  { %1024 = vmatprep.subr.bf16.mxu0 %v1023_v10  ;;  %v688_v10 = vld [vmem:[#allocation8 + $0x3d0] sm:$0xff]  ;;  %v1041_v27 = vpack.c.bf16 %v628_v21, %v626_v19 }
 0x2bd   :  { %1026 = vmatpush1.bf16.msra.mxu0 %v1025_v17  ;;  %v1101_v17 = vpack.c.bf16 %v688_v10, %v686_v3 }
 0x2be   :  { %1090 = vmatpush1.bf16.msra.mxu1 %v1089_v28  ;;  %1028 = vmatprep.subr.bf16.mxu0 %v1027_v31  ;;  %v693_v28 = vld [vmem:[#allocation8 + $0x3f8] sm:$0xff]  ;;  %v692_v31 = vld [vmem:[#allocation8 + $0x3f0] sm:$0xff] }
 0x2bf   :  { %1092 = vmatprep.subr.bf16.mxu1 %v1091_v37  ;;  %v1103_v29 = vpack.c.bf16 %v693_v28, %v691_v26  ;;  %v1105_v32 = vpack.c.bf16 %v692_v31, %v690_v30 }
 0x2c1   :  { %1030 = vmatpush1.bf16.msra.mxu0 %v1029_v34 }
 0x2c2   :  { %1094 = vmatpush1.bf16.msra.mxu1 %v1093_v40  ;;  %1032 = vmatprep.subr.bf16.mxu0 %v1031_v44 }
 0x2c3   :  { %1096 = vmatprep.subr.bf16.mxu1 %v1095_v51 }
 0x2c4   :  { %v1125_v54 = vpop.eup %1124 }
 0x2c5   :  { %v422_v58 = vrot.slane %v1125_v54, %v1436_v43  ;;  %v1443_v20 = vrot.slane %v1125_v54, %v1440_v59  ;;  %1034 = vmatpush1.bf16.msra.mxu0 %v1033_v47  ;;  %v1097_v54 = vpack.c.bf16 %v684_v53, %v682_v52 }
 0x2c6   :  { %1036 = vmatprep.subr.bf16.mxu0 %v1035_v57 }
 0x2c7   :  { %428 = vbcast.lane.b32.xlu1 %v422_v58, 264  ;;  %424 = vbcast.lane.b32.xlu0 %v422_v58, 256 }
 0x2c8   :  { %1098 = vmatpush1.bf16.msra.mxu1 %v1097_v54 }
 0x2c9   :  { %1100 = vmatprep.subr.bf16.mxu1 %v1099_v7 }
 0x2cb   :  { %443 = vbcast.lane.b32.xlu1 %v1443_v20, 256  ;;  %432 = vbcast.lane.b32.xlu0 %v422_v58, 272 }
 0x2cc   :  { %1102 = vmatpush1.bf16.msra.mxu1 %v1101_v17 }
 0x2cd   :  { %1104 = vmatprep.subr.bf16.mxu1 %v1103_v29 }
 0x2cf   :  { %447 = vbcast.lane.b32.xlu1 %v1443_v20, 264  ;;  %436 = vbcast.lane.b32.xlu0 %v422_v58, 280  ;;  %v622_v58 = vld [vmem:[#allocation8 + $0x1c0] sm:$0xff] }
 0x2d0   :  { %v1037_v61 = vpack.c.bf16 %v624_v60, %v622_v58  ;;  %1106 = vmatpush1.bf16.msra.mxu1 %v1105_v32 }
 0x2d2   :  { %1038 = vmatpush1.bf16.msra.mxu0 %v1037_v61 }
 0x2d3   :  { %451 = vbcast.lane.b32.xlu1 %v1443_v20, 272  ;;  %1040 = vmatprep.subr.bf16.mxu0 %v1039_v18 }
 0x2d6   :  { %1042 = vmatpush1.bf16.msra.mxu0 %v1041_v27 }
 0x2d7   :  { %455 = vbcast.lane.b32.xlu1 %v1443_v20, 280 }
 0x339   :  { %v429_v33 = vpop.permute.xlu1 %428  ;;  %v425_v34 = vpop.permute.xlu0 %424 }
 0x33a   :  { %v1450_v35 = vmul.f32 %v429_v33, %v1367_v8  ;;  %v1453_v36 = vmul.f32 %v429_v33, %v1369_v9  ;;  %v1456_v20 = vmul.f32 %v425_v34, %v1355_v2  ;;  %v1459_v37 = vmul.f32 %v425_v34, %v1359_v4 }
 0x33c   :  { %v473_v8 = vmax.f32 %v1456_v20, %v1450_v35  ;;  %v482_v9 = vmax.f32 %v1459_v37, %v1453_v36  ;;  %v509_v2 = vadd.f32 %v1450_v35, %v1456_v20  ;;  %v518_v4 = vadd.f32 %v1453_v36, %v1459_v37 }
 0x33d   :  { %v444_v38 = vpop.permute.xlu1 %443  ;;  %v433_v39 = vpop.permute.xlu0 %432 }
 0x33e   :  { %v1462_v40 = vmul.f32 %v433_v39, %v1379_v14  ;;  %v1465_v41 = vmul.f32 %v433_v39, %v1381_v15 }
 0x340   :  { %v474_v47 = vmax.f32 %v473_v8, %v1462_v40  ;;  %v483_v48 = vmax.f32 %v482_v9, %v1465_v41  ;;  %v510_v49 = vadd.f32 %v509_v2, %v1462_v40  ;;  %v519_v51 = vadd.f32 %v518_v4, %v1465_v41 }
 0x341   :  { %v448_v42 = vpop.permute.xlu1 %447  ;;  %v437_v44 = vpop.permute.xlu0 %436 }
 0x342   :  { %v1476_v14 = vmul.f32 %v448_v42, %v1361_v5  ;;  %v1479_v15 = vmul.f32 %v448_v42, %v1363_v6  ;;  %v1482_v45 = vmul.f32 %v437_v44, %v1399_v24  ;;  %v1485_v46 = vmul.f32 %v437_v44, %v1401_v25 }
 0x343   :  { %v1492_v5 = vmul.f32 %v444_v38, %v1351_v0  ;;  %v1495_v6 = vmul.f32 %v444_v38, %v1353_v1 }
 0x344   :  { %v475_v24 = vmax.f32 %v474_v47, %v1482_v45  ;;  %v484_v52 = vmax.f32 %v483_v48, %v1485_v46  ;;  %v511_v25 = vadd.f32 %v510_v49, %v1482_v45  ;;  %v520_v53 = vadd.f32 %v519_v51, %v1485_v46 }
 0x345   :  { %v452_v54 = vpop.permute.xlu1 %451  ;;  %v491_v55 = vmax.f32 %v1492_v5, %v1476_v14  ;;  %v500_v56 = vmax.f32 %v1495_v6, %v1479_v15  ;;  %v527_v62 = vadd.f32 %v1476_v14, %v1492_v5  ;;  %v536_v63 = vadd.f32 %v1479_v15, %v1495_v6 }
 0x346   :  { %v1506_v0 = vmul.f32 %v452_v54, %v1375_v12  ;;  %v1509_v1 = vmul.f32 %v452_v54, %v1377_v13  ;;  %v476_v57 = vrot.slane %v475_v24, 4  ;;  %v485_v58 = vrot.slane %v484_v52, 4 }
 0x347   :  { %v512_v60 = vrot.slane %v511_v25, 4  ;;  %v521_v61 = vrot.slane %v520_v53, 4 }
 0x348   :  { %v492_v3 = vmax.f32 %v491_v55, %v1506_v0  ;;  %v501_v7 = vmax.f32 %v500_v56, %v1509_v1  ;;  %v477_v10 = vmax.f32 %v475_v24, %v476_v57  ;;  %v486_v12 = vmax.f32 %v484_v52, %v485_v58 }
 0x349   :  { %v513_v11 = vadd.f32 %v512_v60, %v511_v25  ;;  %v522_v16 = vadd.f32 %v521_v61, %v520_v53  ;;  %v456_v13 = vpop.permute.xlu1 %455  ;;  %v528_v17 = vadd.f32 %v527_v62, %v1506_v0  ;;  %v537_v18 = vadd.f32 %v536_v63, %v1509_v1 }
 0x34a   :  { %v1520_v19 = vmul.f32 %v456_v13, %v1395_v22  ;;  %v1523_v21 = vmul.f32 %v456_v13, %v1397_v23  ;;  %v478_v26 = vrot.slane %v477_v10, 2  ;;  %v487_v27 = vrot.slane %v486_v12, 2 }
 0x34b   :  { %v514_v28 = vrot.slane %v513_v11, 2  ;;  %v523_v29 = vrot.slane %v522_v16, 2 }
 0x34c   :  { %v493_v30 = vmax.f32 %v492_v3, %v1520_v19  ;;  %v502_v31 = vmax.f32 %v501_v7, %v1523_v21  ;;  %v529_v32 = vadd.f32 %v528_v17, %v1520_v19  ;;  %v538_v33 = vadd.f32 %v537_v18, %v1523_v21 }
 0x34d   :  { %v515_v34 = vadd.f32 %v514_v28, %v513_v11  ;;  %v524_v38 = vadd.f32 %v523_v29, %v522_v16  ;;  %v479_v23 = vmax.f32 %v477_v10, %v478_v26  ;;  %v488_v2 = vmax.f32 %v486_v12, %v487_v27 }
 0x34e   :  { %v494_v39 = vrot.slane %v493_v30, 4  ;;  %v503_v22 = vrot.slane %v502_v31, 4  ;;  %v530_v8 = vrot.slane %v529_v32, 4  ;;  %v539_v9 = vrot.slane %v538_v33, 4 }
 0x34f   :  { %v525_v48 = vrot.slane %v524_v38, 1  ;;  %v516_v49 = vrot.slane %v515_v34, 1  ;;  %v489_v53 = vrot.slane %v488_v2, 1  ;;  %v480_v54 = vrot.slane %v479_v23, 1 }
 0x350   :  { %v495_v4 = vmax.f32 %v493_v30, %v494_v39  ;;  %v504_v42 = vmax.f32 %v502_v31, %v503_v22  ;;  %v531_v44 = vadd.f32 %v530_v8, %v529_v32  ;;  %v540_v47 = vadd.f32 %v539_v9, %v538_v33 }
 0x351   :  { %v526_v60 = vadd.f32 %v525_v48, %v524_v38  ;;  %v517_v61 = vadd.f32 %v516_v49, %v515_v34  ;;  %v490_v10 = vmax.f32 %v488_v2, %v489_v53  ;;  %v481_v12 = vmax.f32 %v479_v23, %v480_v54 }
 0x352   :  { %v496_v51 = vrot.slane %v495_v4, 2  ;;  %v505_v24 = vrot.slane %v504_v42, 2  ;;  %v532_v52 = vrot.slane %v531_v44, 2  ;;  %v541_v25 = vrot.slane %v540_v47, 2 }
 0x353   :  { %v547_v18 = vmul.f32 0.03125, %v526_v60  ;;  %v546_v26 = vmul.f32 0.03125, %v517_v61 }
 0x354   :  { %v497_v55 = vmax.f32 %v495_v4, %v496_v51  ;;  %v533_v56 = vadd.f32 %v532_v52, %v531_v44  ;;  %v506_v57 = vmax.f32 %v504_v42, %v505_v24  ;;  %v542_v58 = vadd.f32 %v541_v25, %v540_v47 }
 0x355   :  { %v1263_v47 = vmov 1966171168  }
 0x356   :  { %v507_v62 = vrot.slane %v506_v57, 1  ;;  %v498_v63 = vrot.slane %v497_v55, 1  ;;  %v543_v3 = vrot.slane %v542_v58, 1  ;;  %v534_v7 = vrot.slane %v533_v56, 1 }
 0x357   :  { %v852_v48 = vunpack.c.l.s4 %v1263_v47 }
 0x358   :  { %v508_v11 = vmax.f32 %v506_v57, %v507_v62  ;;  %v499_v16 = vmax.f32 %v497_v55, %v498_v63  ;;  %v544_v13 = vadd.f32 %v543_v3, %v542_v58  ;;  %v535_v17 = vadd.f32 %v534_v7, %v533_v56 }
 0x359   :  { %v853_v49 = vunpack.c.0.s8 %v852_v48 }
 0x35a   :  { %v555_v27 = vsel %vm198_vm4, %v508_v11, %v490_v10  ;;  %v554_v28 = vsel %vm198_vm4, %v499_v16, %v481_v12  ;;  %v549_v29 = vmul.f32 0.03125, %v544_v13  ;;  %v548_v30 = vmul.f32 0.03125, %v535_v17 }
 0x35b   :  { %758 = vmatprep.mubr.f32.mxu0 %v555_v27  ;;  %v856_v24 = vsub.s32 %v853_v49, %v1415_v50 }
 0x35c   :  { %759 = vmatmul.mubr.f32.vlgmr.msra.gmra.mrb[2].mxu0 %v554_v28  ;;  %v563_v31 = vsel %vm198_vm4, %v549_v29, %v547_v18  ;;  %v562_v32 = vsel %vm198_vm4, %v548_v30, %v546_v26 }
 0x35d   :  { %829 = vmatprep.mubr.f32.mxu1 %v563_v31 }
 0x35e   :  { %830 = vmatmul.mubr.f32.vlgmr.msra.gmra.mrb[2].mxu1 %v562_v32 }
 0x42f   :  { %v760_v33 = vpop.f32.mrb[2].mxu0 }
 0x430   :  { %v762_v34 = vpop.f32.mrb[3].mxu0 }
 0x431   :  { %v831_v38 = vpop.f32.mrb[2].mxu1 }
 0x432   :  { %v832_v39 = vadd.f32 %v831_v38, %v760_v33  ;;  %v833_v22 = vpop.f32.mrb[3].mxu1 }
 0x433   :  { %v834_v8 = vadd.f32 %v833_v22, %v762_v34 }
 0x434   :  { %v948_v9 = vmul.f32 -1.442695, %v832_v39 }
 0x435   :  { %v949_v23 = vmul.f32 -1.442695, %v834_v8 }
 0x436   :  { %1126 = vpow2.f32 %v948_v9 }
 0x437   :  { %1128 = vpow2.f32 %v949_v23 }
 0x440   :  { %v1127_v2 = vpop.eup %1126 }
 0x441   :  { %v1129_v4 = vpop.eup %1128  ;;  %v842_v42 = vadd.f32 1.0, %v1127_v2 }
 0x442   :  { %v843_v44 = vadd.f32 1.0, %v1129_v4 }
 0x443   :  { %1130 = vrcp.f32 %v842_v42 }
 0x444   :  { %1132 = vrcp.f32 %v843_v44 }
 0x44d   :  { %v1131_v51 = vpop.eup %1130 }
 0x44e   :  { %v1133_v52 = vpop.eup %1132 }
 0x44f   :  { %v850_v25 = vcombine.low %v1131_v51, %v1133_v52 }
 0x451   :  { %v857_v53 = vrot.slane %v850_v25, %v856_v24 }
 0x453   :  { %v858_v54 = vcombine.high %v857_v53, %v857_v53  ;;  %v865_v55 = vrot.slane %v857_v53, %v856_v24 }
 0x455   :  { %v872_v56 = vrot.slane %v858_v54, %v856_v24  ;;  %v876_v57 = vrot.slane %v865_v55, %v1436_v43  ;;  %v880_v58 = vrot.slane %v865_v55, %v1440_v59 }
 0x457   :  { %v884_v60 = vrot.slane %v872_v56, %v1436_v43  ;;  %v888_v61 = vrot.slane %v872_v56, %v1440_v59  ;;  %v893_v62 = vmul.f32 %v876_v57, %v1456_v20  ;;  %v894_v63 = vmul.f32 %v880_v58, %v1459_v37 }
 0x458   :  { %v895_v50 = vmul.f32 %v876_v57, %v1450_v35  ;;  %v896_v3 = vmul.f32 %v880_v58, %v1453_v36  ;;  %v897_v7 = vmul.f32 %v876_v57, %v1462_v40  ;;  %v898_v10 = vmul.f32 %v880_v58, %v1465_v41 }
 0x459   :  { %v899_v12 = vmul.f32 %v876_v57, %v1482_v45  ;;  %v900_v43 = vmul.f32 %v880_v58, %v1485_v46  ;;  %v901_v59 = vmul.f32 %v884_v60, %v1492_v5  ;;  %v902_v20 = vmul.f32 %v888_v61, %v1495_v6  ;;  %909 = vst [vmem:[#allocation10] sm:$0xff] %v893_v62 }
 0x45a   :  { %910 = vst [vmem:[#allocation10 + $0x8] sm:$0xff] %v894_v63  ;;  %v903_v35 = vmul.f32 %v884_v60, %v1476_v14  ;;  %v904_v36 = vmul.f32 %v888_v61, %v1479_v15  ;;  %v905_v37 = vmul.f32 %v884_v60, %v1506_v0  ;;  %v906_v40 = vmul.f32 %v888_v61, %v1509_v1 }
 0x45b   :  { %911 = vst [vmem:[#allocation10 + $0x10] sm:$0xff] %v895_v50  ;;  %912 = vst [vmem:[#allocation10 + $0x18] sm:$0xff] %v896_v3  ;;  %v907_v41 = vmul.f32 %v884_v60, %v1520_v19  ;;  %v908_v45 = vmul.f32 %v888_v61, %v1523_v21 }
 0x45c   :  { %913 = vst [vmem:[#allocation10 + $0x20] sm:$0xff] %v897_v7  ;;  %914 = vst [vmem:[#allocation10 + $0x28] sm:$0xff] %v898_v10 }
 0x45d   :  { %915 = vst [vmem:[#allocation10 + $0x30] sm:$0xff] %v899_v12  ;;  %916 = vst [vmem:[#allocation10 + $0x38] sm:$0xff] %v900_v43 }
 0x45e   :  { %917 = vst [vmem:[#allocation10 + $0x40] sm:$0xff] %v901_v59  ;;  %918 = vst [vmem:[#allocation10 + $0x48] sm:$0xff] %v902_v20 }
 0x45f   :  { %919 = vst [vmem:[#allocation10 + $0x50] sm:$0xff] %v903_v35  ;;  %920 = vst [vmem:[#allocation10 + $0x58] sm:$0xff] %v904_v36 }
 0x460   :  { %921 = vst [vmem:[#allocation10 + $0x60] sm:$0xff] %v905_v37  ;;  %922 = vst [vmem:[#allocation10 + $0x68] sm:$0xff] %v906_v40 }
 0x461   :  { %923 = vst [vmem:[#allocation10 + $0x70] sm:$0xff] %v907_v41  ;;  %924 = vst [vmem:[#allocation10 + $0x78] sm:$0xff] %v908_v45 }
 0x462   :  { %1233 = shalt.err (!%p1230_p8)
}
 0x463   :  { %s1234_s17 = scalar_lea.hbm %s1573_s4, 2048 }
 0x464   :  { %p1235_p9 = scmp.ne.s32.totalorder %s1573_s4, %s1234_s17  ;;  %p1238_p10 = scmp.lt.u32.totalorder %s1234_s17, %s1573_s4 }
 0x466   :  { %p1240_p11 = pnand %p1238_p10, %p1235_p9 }
 0x468   :  { %1243 = shalt.err (!%p1240_p11)
}
 0x469   :  { %936 = dma.vmem_to_hbm [thread:$0]  %s931_s12, 2048, %s1573_s4, [#allocation4], %s1256_s1, %s1256_s1, %s1257_s13  }
 0x46a   :  { %1250 = dma.done.wait [#allocation4], 2048  }
 0x46b   :  { %1251 = vsyncadd [#allocation4], 4294965248 }
 0x46c   :  { %940 = vsyncpa [#allocation3], 1 }
 0x46d   :  { %941 = vsyncpa [#allocation6], 1 }
 0x46e   :  { %942 = vsyncpa [#allocation9], 1 }
 0x46f   :  { %943 = vsyncpa [#allocation4], 1 }

</bundles_post_ra>
